<compile_context>
chip_gen: v5e
topology: v5e:2x2
jax: 0.10.0
libtpu: 0.0.40
codegen_flags: <defaults>
</compile_context>

<pallas_src>
import functools

import jax
import jax.numpy as jnp
from jax.experimental import pallas as pl
from jax.experimental.pallas import tpu as pltpu


def _round_up(x, m):
    return (x + m - 1) // m * m


def _mlp_gate_kernel(x_ref, w_ref, p_ref, o_ref, *, eps, f_valid, f_padded):
    # x_ref: (TM, H)   input row tile (native dtype)
    # w_ref: (H,  Fp)  linear weight, (in, out) layout, zero-padded columns
    # p_ref: (4,  Fp)  f32 rows: [linear bias, ln weight, ln bias, lane mask]
    # o_ref: (TM, Fp)  output tile
    # Matmul in native dtype; f32 accumulation on the MXU.
    h = jnp.dot(x_ref[...], w_ref[...], preferred_element_type=jnp.float32)
    h = h + p_ref[0:1, :]                        # linear bias (f32)

    # LayerNorm over the valid F columns (biased variance, as in PyTorch).
    # Padded weight/bias columns are zero, so sum(h) only sees valid columns.
    inv_f = 1.0 / float(f_valid)
    u = jnp.sum(h, axis=-1, keepdims=True) * inv_f
    d = h - u
    if f_padded != f_valid:
        d = d * p_ref[3:4, :]                    # zero padded lanes for the variance
    s = jnp.sum(d * d, axis=-1, keepdims=True) * inv_f
    xn = d * jax.lax.rsqrt(s + eps)
    y = p_ref[1:2, :] * xn + p_ref[2:3, :]

    o_ref[...] = jax.nn.sigmoid(y).astype(o_ref.dtype)


def mlp_gate(hidden_states, w, b, ln_w, ln_b, *, eps=1e-5, tile_m=512):
    """hidden_states: (..., H); w: (H, F) (in, out layout); b, ln_w, ln_b: (F,)."""
    orig_shape = hidden_states.shape
    H = orig_shape[-1]
    F = w.shape[1]
    out_dtype = hidden_states.dtype

    x2d = hidden_states.reshape(-1, H)
    N = x2d.shape[0]

    # Row tiling: large tiles for MXU fill, clipped for tiny inputs.
    tm = min(_round_up(tile_m, 8), _round_up(max(N, 1), 8))
    Np = _round_up(N, tm)
    # Lane-dense output: pad feature axis to a multiple of 128.
    Fp = _round_up(F, 128)

    if Np != N:
        x2d = jnp.pad(x2d, ((0, Np - N), (0, 0)))
    wp = w if Fp == F else jnp.pad(w, ((0, 0), (0, Fp - F)))

    pad_f = (0, Fp - F)
    params = jnp.stack([
        jnp.pad(b.astype(jnp.float32), pad_f),
        jnp.pad(ln_w.astype(jnp.float32), pad_f),
        jnp.pad(ln_b.astype(jnp.float32), pad_f),
        (jnp.arange(Fp) < F).astype(jnp.float32),      # valid-lane mask
    ])                                                  # (4, Fp) f32

    kernel = functools.partial(_mlp_gate_kernel, eps=eps, f_valid=F, f_padded=Fp)
    grid = (Np // tm,)

    # VMEM budget: double-buffered weight + params (worst case) + pipelined
    # x/out tiles, with 2x headroom; clamp to [32 MiB, 64 MiB] (v7x ceiling).
    est = (2 * H * Fp * wp.dtype.itemsize
           + 2 * tm * H * x2d.dtype.itemsize
           + 2 * tm * Fp * jnp.dtype(out_dtype).itemsize
           + 2 * 4 * Fp * 4)
    vmem_limit = int(min(max(2 * est, 32 * 1024 * 1024), 64 * 1024 * 1024))

    out = pl.pallas_call(
        kernel,
        out_shape=jax.ShapeDtypeStruct((Np, Fp), out_dtype),
        grid_spec=pltpu.PrefetchScalarGridSpec(
            num_scalar_prefetch=0,
            grid=grid,
            in_specs=[
                pl.BlockSpec((tm, H), lambda i: (i, 0)),   # x rows (pipelined)
                pl.BlockSpec((H, Fp), lambda i: (0, 0)),   # resident weight
                pl.BlockSpec((4, Fp), lambda i: (0, 0)),   # fused f32 params
            ],
            out_specs=pl.BlockSpec((tm, Fp), lambda i: (i, 0)),
        ),
        compiler_params=pltpu.CompilerParams(
            dimension_semantics=("parallel",),
            vmem_limit_bytes=vmem_limit,
        ),
    )(x2d, wp, params)

    out = out[:N, :F]
    return out.reshape(orig_shape[:-1] + (F,))


def _reference(hidden_states, w, b, ln_w, ln_b, eps=1e-5):
    h = jnp.einsum('...h,hf->...f', hidden_states, w) + b
    u = jnp.mean(h, axis=-1, keepdims=True)
    s = jnp.mean((h - u) ** 2, axis=-1, keepdims=True)
    xn = (h - u) / jnp.sqrt(s + eps)
    return jax.nn.sigmoid(ln_w * xn + ln_b)


def _make_params(key, hidden, out_features, dtype=jnp.float32):
    k_w, k_b = jax.random.split(key)
    bound = 1.0 / jnp.sqrt(hidden)
    # PyTorch Linear weight is (out, in); the kernel takes (in, out).
    w = jax.random.uniform(k_w, (hidden, out_features), minval=-bound,
                           maxval=bound, dtype=dtype)
    b = jax.random.uniform(k_b, (out_features,), minval=-bound,
                           maxval=bound, dtype=dtype)
    ln_w = jnp.ones((out_features,), dtype=dtype)
    ln_b = jnp.zeros((out_features,), dtype=dtype)
    return w, b, ln_w, ln_b


if __name__ == "__main__":
    key = jax.random.PRNGKey(0)
    k_x, k_p, k_x2, k_p2 = jax.random.split(key, 4)

    # Case 1: default out_features = hidden_size (as in the PyTorch module).
    batch, seq, hidden = 2, 8, 32
    x = jax.random.normal(k_x, (batch, seq, hidden), dtype=jnp.float32)
    w, b, ln_w, ln_b = _make_params(k_p, hidden, hidden)

    y = jax.block_until_ready(mlp_gate(x, w, b, ln_w, ln_b))
    y_ref = _reference(x, w, b, ln_w, ln_b)
    assert y.shape == (batch, seq, hidden)
    assert jnp.allclose(y, y_ref, atol=1e-5, rtol=1e-5)

    # Case 2: ragged row count + non-square out_features (exercises row/F padding).
    batch2, seq2, out_f2 = 3, 5, 48
    x2 = jax.random.normal(k_x2, (batch2, seq2, hidden), dtype=jnp.float32)
    w2, b2, ln_w2, ln_b2 = _make_params(k_p2, hidden, out_f2)

    y2 = jax.block_until_ready(mlp_gate(x2, w2, b2, ln_w2, ln_b2))
    y2_ref = _reference(x2, w2, b2, ln_w2, ln_b2)
    assert y2.shape == (batch2, seq2, out_f2)
    assert jnp.allclose(y2, y2_ref, atol=1e-5, rtol=1e-5)

    print("KERNEL_OK")
</pallas_src>

<mosaic_0001>
module attributes {stable_mosaic.version = 11 : i64} {
  func.func @_mlp_gate_kernel(%arg0: i32, %arg1: memref<16x32xf32, #tpu.memory_space<vmem>>, %arg2: memref<32x128xf32, #tpu.memory_space<vmem>>, %arg3: memref<4x128xf32, #tpu.memory_space<vmem>>, %arg4: memref<16x128xf32, #tpu.memory_space<vmem>>) attributes {dimension_semantics = [#tpu.dimension_semantics<parallel>], iteration_bounds = array<i64: 1>, scalar_prefetch = 0 : i64, scratch_operands = 0 : i64, tpu.core_type = #tpu.core_type<tc>, window_params = [{transform_indices = @transform_0, window_bounds = array<i64: 16, 32>}, {pipeline_mode = #tpu.pipeline_mode<synchronous>, transform_indices = @transform_1, window_bounds = array<i64: 32, 128>}, {pipeline_mode = #tpu.pipeline_mode<synchronous>, transform_indices = @transform_2, window_bounds = array<i64: 4, 128>}, {transform_indices = @transform_3, window_bounds = array<i64: 16, 128>}]} {
    %c0 = arith.constant 0 : index
    %c0_0 = arith.constant 0 : index
    %0 = vector.load %arg1[%c0, %c0_0] : memref<16x32xf32, #tpu.memory_space<vmem>>, vector<16x32xf32>
    %c0_1 = arith.constant 0 : index
    %c0_2 = arith.constant 0 : index
    %1 = vector.load %arg2[%c0_1, %c0_2] : memref<32x128xf32, #tpu.memory_space<vmem>>, vector<32x128xf32>
    %cst = arith.constant dense<0.000000e+00> : vector<16x128xf32>
    %2 = tpu.matmul %0, %1, %cst {dimension_numbers = #tpu.dot_dimension_numbers<[1], [0], [0], [1], [0, 0, 1, 1], [], []>} : vector<16x32xf32>, vector<32x128xf32>, vector<16x128xf32> -> vector<16x128xf32>
    %c0_3 = arith.constant 0 : index
    %c0_4 = arith.constant 0 : index
    %3 = vector.load %arg3[%c0_3, %c0_4] : memref<4x128xf32, #tpu.memory_space<vmem>>, vector<1x128xf32>
    %4 = vector.broadcast %3 : vector<1x128xf32> to vector<16x128xf32>
    %5 = arith.addf %2, %4 : vector<16x128xf32>
    %cst_5 = arith.constant dense<0.000000e+00> : vector<16xf32>
    %6 = vector.multi_reduction <add>, %5, %cst_5 [1] : vector<16x128xf32> to vector<16xf32>
    %7 = vector.shape_cast %6 : vector<16xf32> to vector<16x1xf32>
    %cst_6 = arith.constant 3.125000e-02 : f32
    %8 = vector.broadcast %cst_6 : f32 to vector<16x1xf32>
    %9 = arith.mulf %7, %8 : vector<16x1xf32>
    %10 = vector.broadcast %9 : vector<16x1xf32> to vector<16x128xf32>
    %11 = arith.subf %5, %10 : vector<16x128xf32>
    %c3 = arith.constant 3 : index
    %c0_7 = arith.constant 0 : index
    %12 = vector.load %arg3[%c3, %c0_7] : memref<4x128xf32, #tpu.memory_space<vmem>>, vector<1x128xf32>
    %13 = vector.broadcast %12 : vector<1x128xf32> to vector<16x128xf32>
    %14 = arith.mulf %11, %13 : vector<16x128xf32>
    %15 = arith.mulf %14, %14 : vector<16x128xf32>
    %cst_8 = arith.constant dense<0.000000e+00> : vector<16xf32>
    %16 = vector.multi_reduction <add>, %15, %cst_8 [1] : vector<16x128xf32> to vector<16xf32>
    %17 = vector.shape_cast %16 : vector<16xf32> to vector<16x1xf32>
    %cst_9 = arith.constant 3.125000e-02 : f32
    %18 = vector.broadcast %cst_9 : f32 to vector<16x1xf32>
    %19 = arith.mulf %17, %18 : vector<16x1xf32>
    %cst_10 = arith.constant 9.99999974E-6 : f32
    %20 = vector.broadcast %cst_10 : f32 to vector<16x1xf32>
    %21 = arith.addf %19, %20 : vector<16x1xf32>
    %22 = math.rsqrt %21 : vector<16x1xf32>
    %23 = vector.broadcast %22 : vector<16x1xf32> to vector<16x128xf32>
    %24 = arith.mulf %14, %23 : vector<16x128xf32>
    %c1 = arith.constant 1 : index
    %c0_11 = arith.constant 0 : index
    %25 = vector.load %arg3[%c1, %c0_11] : memref<4x128xf32, #tpu.memory_space<vmem>>, vector<1x128xf32>
    %26 = vector.broadcast %25 : vector<1x128xf32> to vector<16x128xf32>
    %27 = arith.mulf %26, %24 : vector<16x128xf32>
    %c2 = arith.constant 2 : index
    %c0_12 = arith.constant 0 : index
    %28 = vector.load %arg3[%c2, %c0_12] : memref<4x128xf32, #tpu.memory_space<vmem>>, vector<1x128xf32>
    %29 = vector.broadcast %28 : vector<1x128xf32> to vector<16x128xf32>
    %30 = arith.addf %27, %29 : vector<16x128xf32>
    %31 = arith.negf %30 : vector<16x128xf32>
    %32 = math.exp %31 : vector<16x128xf32>
    %cst_13 = arith.constant 1.000000e+00 : f32
    %33 = vector.broadcast %cst_13 : f32 to vector<16x128xf32>
    %34 = arith.addf %33, %32 : vector<16x128xf32>
    %35 = arith.divf %33, %34 : vector<16x128xf32>
    %c0_14 = arith.constant 0 : index
    %c0_15 = arith.constant 0 : index
    %36 = vector.load %arg4[%c0_14, %c0_15] : memref<16x128xf32, #tpu.memory_space<vmem>>, vector<16x128xf32>
    tpu.vector_store %arg4[%c0_14, %c0_15], %35 {strides = array<i32>} : memref<16x128xf32, #tpu.memory_space<vmem>>, vector<16x128xf32>,
    return
  }
  func.func @transform_0(%arg0: i32) -> (i32, i32) {
    %c0_i32 = arith.constant 0 : i32
    %c0_i32_0 = arith.constant 0 : i32
    return %arg0, %c0_i32 : i32, i32
  }
  func.func @transform_1(%arg0: i32) -> (i32, i32) {
    %c0_i32 = arith.constant 0 : i32
    %c0_i32_0 = arith.constant 0 : i32
    %c0_i32_1 = arith.constant 0 : i32
    return %c0_i32, %c0_i32_0 : i32, i32
  }
  func.func @transform_2(%arg0: i32) -> (i32, i32) {
    %c0_i32 = arith.constant 0 : i32
    %c0_i32_0 = arith.constant 0 : i32
    %c0_i32_1 = arith.constant 0 : i32
    return %c0_i32, %c0_i32_0 : i32, i32
  }
  func.func @transform_3(%arg0: i32) -> (i32, i32) {
    %c0_i32 = arith.constant 0 : i32
    %c0_i32_0 = arith.constant 0 : i32
    return %arg0, %c0_i32 : i32, i32
  }
}

</mosaic_0001>

<bundles_post_ra>
// kernel: tpu_custom_call.1
= control target key start
LH: loop header
LB: loop body
LE: loop exit
PB: predicated region body
PF: predicated region fallthrough
CT: control target
= control target key end

     0   :  { %8 = vsyncpa [#allocation3], 0  ;;  %s389_s0 = inlined_call_operand.hbm [shape: f32[16,32], index: 0, kind: input, shape index: {}]   ;;  %s390_s1 = inlined_call_operand.hbm [shape: f32[32,128], index: 1, kind: input, shape index: {}]   ;;  %s391_s2 = inlined_call_operand.hbm [shape: f32[4,128], index: 2, kind: input, shape index: {}]   ;;  %s392_s3 = inlined_call_operand.hbm [shape: f32[16,128], index: 3, kind: output, shape index: {}]  }
   0x1   :  { %9 = vsyncpa [#allocation6], 0 }
   0x2   :  { %10 = vsyncpa [#allocation4], 0  ;;  %s28_s14 = sshll.u32 %s390_s1, 4  ;;  %s342_s15 = smov [#allocation5]   ;;  %s29_s14 = int_to_ptr.hbm [resolvable:$true] %s28_s14 }
   0x3   :  { %s30_s16 = sshll.u32 %s342_s15, 4  ;;  %s15_s19 = sshll.u32 %s389_s0, 4  ;;  %s31_s16 = int_to_ptr.vmem [resolvable:$true] %s30_s16  ;;  %s16_s19 = int_to_ptr.hbm [resolvable:$true] %s15_s19 }
   0x4   :  { %s343_s20 = smov 128   ;;  %s344_s21 = smov 8  }
   0x5   :  { %36 = dma.hbm_to_vmem [thread:$0]  %s29_s14, 512, %s31_s16, [#allocation6], %s343_s20, %s343_s20, %s344_s21  }
   0x6   :  { %s345_s22 = smov [#allocation2]   ;;  %s42_s1 = sshll.u32 %s391_s2, 4  ;;  %s43_s1 = int_to_ptr.hbm [resolvable:$true] %s42_s1 }
   0x7   :  { %s17_s23 = sshll.u32 %s345_s22, 4  ;;  %s346_s0 = smov [#allocation7]   ;;  %s18_s23 = int_to_ptr.vmem [resolvable:$true] %s17_s23 }
   0x8   :  { %23 = dma.hbm_to_vmem [thread:$0]  %s16_s19, 256, %s18_s23, [#allocation3], %s343_s20, %s343_s20, %s344_s21  }
   0x9   :  { %s44_s26 = sshll.u32 %s346_s0, 4  ;;  %s45_s26 = int_to_ptr.vmem [resolvable:$true] %s44_s26 }
   0xa   :  { %47 = dma.hbm_to_vmem [thread:$0]  %s43_s1, 64, %s45_s26, [#allocation6]  }
   0xb   :  { %336 = dma.done.wait [#allocation3], 256  }
   0xc   :  { %337 = vsyncadd [#allocation3], 4294967040 }
   0xd   :  { %338 = dma.done.wait [#allocation6], 576  }
   0xe   :  { %339 = vsyncadd [#allocation6], 4294966720  ;;  %v65_v0 = vld [vmem:[#allocation5 + $0x18] sm:$0xff]  ;;  %v64_v1 = vld [vmem:[#allocation5 + $0x10] sm:$0xff]  ;;  %vm68_vm0 = vcmask 261120   ;;  %s347_s2 = smov [#allocation8]  }
   0xf   :  { %87 = vmatpush.msra.mxu0 %v65_v0  ;;  %214 = vmatpush.msra.mxu1 %v65_v0  ;;  %v63_v2 = vld [vmem:[#allocation5 + $0x8] sm:$0xff]  ;;  %v62_v3 = vld [vmem:[#allocation5] sm:$0xff]  ;;  %v60_v4 = vld [vmem:[#allocation2] sm:$0xff]  ;;  %s194_s27 = sshll.u32 %s347_s2, 4  ;;  %s196_s30 = sshll.u32 %s392_s3, 4  ;;  %s195_s27 = int_to_ptr.vmem [resolvable:$true] %s194_s27  ;;  %s197_s30 = int_to_ptr.hbm [resolvable:$true] %s196_s30 }
  0x10   :  { %v61_v5 = vld [vmem:[#allocation2 + $0x8] sm:$0xff]  ;;  %v224_v6 = vld [vmem:[#allocation7] ss:$0 sm:$0xff]  ;;  %v225_v13 = vld [vmem:[#allocation7 + $0x3] ss:$0 sm:$0xff] }
  0x11   :  { %88 = vmatpush.msra.mxu0 %v64_v1  ;;  %215 = vmatpush.msra.mxu1 %v64_v1  ;;  %v226_v36 = vld [vmem:[#allocation7 + $0x1] ss:$0 sm:$0xff]  ;;  %v227_v39 = vld [vmem:[#allocation7 + $0x2] ss:$0 sm:$0xff] }
  0x13   :  { %89 = vmatpush.msra.mxu0 %v63_v2  ;;  %216 = vmatpush.msra.mxu1 %v63_v2 }
  0x15   :  { %90 = vmatpush.msra.mxu0 %v62_v3  ;;  %217 = vmatpush.msra.mxu1 %v62_v3 }
  0x16   :  { %210 = vmatmul.msk.f32.vlgmr.msra.gmra.mxu0 %vm68_vm0, %v60_v4  ;;  %211 = vmatmul.msk.f32.vlgmr.msra.gmra.mxu1 %vm68_vm0, %v61_v5 }
  0x93   :  { %v92_v7 = vpop.f32.mrf.mxu0  ;;  %v95_v9 = vpop.f32.mrf.mxu1 }
  0x94   :  { %v93_v8 = vadd.f32 %v224_v6, %v92_v7  ;;  %v96_v10 = vadd.f32 %v224_v6, %v95_v9 }
  0x96   :  { %98 = vadd.xlane.f32.xlu0 %v93_v8 }
  0x9e   :  { %100 = vadd.xlane.f32.xlu0 %v96_v10 }
 0x109   :  { %v99_v11 = vpop.xlane.xlu0 %98 }
 0x10a   :  { %v102_v12 = vmul.f32 0.03125, %v99_v11 }
 0x10c   :  { %v104_v14 = vsub.f32 %v93_v8, %v102_v12 }
 0x10e   :  { %v108_v15 = vmul.f32 %v225_v13, %v104_v14 }
 0x110   :  { %v110_v16 = vmul.f32 %v108_v15, %v108_v15 }
 0x111   :  { %v101_v17 = vpop.xlane.xlu0 %100 }
 0x112   :  { %v103_v18 = vmul.f32 0.03125, %v101_v17  ;;  %112 = vadd.xlane.f32.xlu1 %v110_v16 }
 0x114   :  { %v105_v19 = vsub.f32 %v96_v10, %v103_v18 }
 0x116   :  { %v109_v20 = vmul.f32 %v225_v13, %v105_v19 }
 0x118   :  { %v111_v21 = vmul.f32 %v109_v20, %v109_v20 }
 0x11a   :  { %114 = vadd.xlane.f32.xlu1 %v111_v21 }
 0x185   :  { %v113_v22 = vpop.xlane.xlu1 %112 }
 0x186   :  { %v116_v23 = vmul.f32 0.03125, %v113_v22 }
 0x188   :  { %v118_v24 = vadd.f32 1e-05, %v116_v23 }
 0x18a   :  { %228 = vrsqrt.f32 %v118_v24  ;;  %vm126_vm2 = vweird.f32 %v118_v24 }
 0x18d   :  { %v115_v25 = vpop.xlane.xlu1 %114 }
 0x18e   :  { %v117_v26 = vmul.f32 0.03125, %v115_v25 }
 0x190   :  { %v229_v27 = vpop.eup %228  ;;  %v119_v28 = vadd.f32 1e-05, %v117_v26 }
 0x191   :  { %v121_v29 = vmul.f32 %v229_v27, %v118_v24  ;;  %vm127_vm1 = vweird.f32 %v229_v27 }
 0x192   :  { %230 = vrsqrt.f32 %v119_v28  ;;  %vm128_vm3 = vmor %vm126_vm2, %vm127_vm1  ;;  %vm136_vm5 = vweird.f32 %v119_v28 }
 0x193   :  { %v122_v30 = vmul.f32 %v229_v27, %v121_v29 }
 0x195   :  { %v123_v31 = vmul.f32 0.5, %v122_v30 }
 0x197   :  { %v124_v32 = vsub.f32 1.5, %v123_v31 }
 0x198   :  { %v231_v33 = vpop.eup %230 }
 0x199   :  { %v125_v34 = vmul.f32 %v229_v27, %v124_v32  ;;  %v131_v35 = vmul.f32 %v231_v33, %v119_v28  ;;  %vm137_vm4 = vweird.f32 %v231_v33 }
 0x19a   :  { %vm138_vm6 = vmor %vm136_vm5, %vm137_vm4 }
 0x19b   :  { %v129_v37 = vsel %vm128_vm3, %v229_v27, %v125_v34  ;;  %v132_v38 = vmul.f32 %v231_v33, %v131_v35 }
 0x19c   :  { %v140_v40 = vmul.f32 %v129_v37, %v108_v15 }
 0x19d   :  { %v133_v41 = vmul.f32 0.5, %v132_v38 }
 0x19e   :  { %v144_v42 = vmul.f32 %v226_v36, %v140_v40 }
 0x19f   :  { %v134_v43 = vsub.f32 1.5, %v133_v41 }
 0x1a0   :  { %v148_v44 = vadd.f32 %v227_v39, %v144_v42 }
 0x1a1   :  { %v135_v45 = vmul.f32 %v231_v33, %v134_v43 }
 0x1a2   :  { %v212_v46 = vmul.f32 -1.442695, %v148_v44 }
 0x1a3   :  { %v139_v47 = vsel %vm138_vm6, %v231_v33, %v135_v45 }
 0x1a4   :  { %232 = vpow2.f32 %v212_v46  ;;  %v141_v48 = vmul.f32 %v139_v47, %v109_v20 }
 0x1a6   :  { %v145_v49 = vmul.f32 %v226_v36, %v141_v48 }
 0x1a8   :  { %v149_v50 = vadd.f32 %v227_v39, %v145_v49 }
 0x1aa   :  { %v233_v51 = vpop.eup %232  ;;  %v213_v52 = vmul.f32 -1.442695, %v149_v50 }
 0x1ab   :  { %v156_v53 = vadd.f32 1.0, %v233_v51 }
 0x1ac   :  { %234 = vpow2.f32 %v213_v52 }
 0x1ad   :  { %236 = vrcp.f32 %v156_v53  ;;  %v169_v59 = vand.u32 2147483648, %v156_v53  ;;  %v167_v61 = vand.u32 2147483647, %v156_v53  ;;  %vm163_vm8 = vweird.f32 %v156_v53 }
 0x1af   :  { %v170_v0 = vor.u32 1.1754944e-38, %v169_v59  ;;  %vm168_vm10 = vcmp.eq.f32.partialorder %v167_v61, 8.507059e+37 }
 0x1b2   :  { %v235_v54 = vpop.eup %234 }
 0x1b3   :  { %v237_v55 = vpop.eup %236  ;;  %v157_v56 = vadd.f32 1.0, %v235_v54 }
 0x1b4   :  { %v159_v57 = vmul.f32 %v237_v55, %v156_v53  ;;  %vm164_vm7 = vweird.f32 %v237_v55 }
 0x1b5   :  { %238 = vrcp.f32 %v157_v56  ;;  %vm165_vm9 = vmor %vm163_vm8, %vm164_vm7  ;;  %v184_v5 = vand.u32 2147483648, %v157_v56  ;;  %v182_v7 = vand.u32 2147483647, %v157_v56  ;;  %vm178_vm12 = vweird.f32 %v157_v56 }
 0x1b6   :  { %v160_v58 = vsub.f32 1.0, %v159_v57 }
 0x1b7   :  { %v185_v9 = vor.u32 1.1754944e-38, %v184_v5  ;;  %vm183_vm14 = vcmp.eq.f32.partialorder %v182_v7, 8.507059e+37 }
 0x1b8   :  { %v161_v60 = vmul.f32 %v237_v55, %v160_v58 }
 0x1ba   :  { %v162_v62 = vadd.f32 %v237_v55, %v161_v60 }
 0x1bb   :  { %v239_v63 = vpop.eup %238 }
 0x1bc   :  { %v166_v1 = vsel %vm165_vm9, %v237_v55, %v162_v62  ;;  %v174_v2 = vmul.f32 %v239_v63, %v157_v56  ;;  %vm179_vm11 = vweird.f32 %v239_v63 }
 0x1bd   :  { %v171_v3 = vsel %vm168_vm10, %v170_v0, %v166_v1  ;;  %vm180_vm13 = vmor %vm178_vm12, %vm179_vm11 }
 0x1be   :  { %v175_v4 = vsub.f32 1.0, %v174_v2  ;;  %188 = vst [vmem:[#allocation8] sm:$0xff] %v171_v3 }
 0x1c0   :  { %v176_v6 = vmul.f32 %v239_v63, %v175_v4 }
 0x1c2   :  { %v177_v8 = vadd.f32 %v239_v63, %v176_v6 }
 0x1c4   :  { %v181_v10 = vsel %vm180_vm13, %v239_v63, %v177_v8 }
 0x1c5   :  { %v186_v11 = vsel %vm183_vm14, %v185_v9, %v181_v10 }
 0x1c6   :  { %189 = vst [vmem:[#allocation8 + $0x8] sm:$0xff] %v186_v11 }
 0x1c7   :  { %202 = dma.vmem_to_hbm [thread:$0]  %s195_s27, 256, %s197_s30, [#allocation4], %s343_s20, %s343_s20, %s344_s21  }
 0x1c8   :  { %340 = dma.done.wait [#allocation4], 256  }
 0x1c9   :  { %341 = vsyncadd [#allocation4], 4294967040 }
 0x1ca   :  { %207 = vsyncpa [#allocation3], 1 }
 0x1cb   :  { %208 = vsyncpa [#allocation6], 1 }
 0x1cc   :  { %209 = vsyncpa [#allocation4], 1 }

</bundles_post_ra>
